<compile_context>
chip_gen: v6e
topology: v6e:2x2x1
jax: 0.10.0
libtpu: 0.0.40
codegen_flags: <defaults>
</compile_context>

<pallas_src>
import jax
import jax.numpy as jnp
from jax import lax
from jax.experimental import pallas as pl
from jax.experimental.pallas import tpu as pltpu


def get_angle_kernel(x_ref, w_ref, b_ref, o_ref):
    # x_ref: (TB, D) VMEM, w_ref: (1, D) VMEM, b_ref: (1, 1) SMEM, o_ref: (TB, D) VMEM
    x = x_ref[...]                                        # (TB, D)
    w = w_ref[...]                                        # (1, D)
    b = b_ref[0, 0]                                       # scalar from SMEM

    # Linear(D -> 1): elementwise multiply (VPU) + lane reduction (XLU) + scalar bias.
    lin = jnp.sum(x * w, axis=-1, keepdims=True) + b      # (TB, 1)

    # abs(lin / sqrt(lin^2)) == abs(lin * rsqrt(lin^2)); exact rsqrt keeps the
    # NaN at lin == 0 (0 * inf = NaN), matching the PyTorch 0/0 behavior.
    r = jnp.abs(lin * lax.rsqrt(lin * lin))               # (TB, 1)

    # Single lane-broadcast into the output tile.
    o_ref[...] = jnp.broadcast_to(r, o_ref.shape).astype(o_ref.dtype)


def get_angle(mol_feature, weight, bias, *, tb=None):
    """mol_feature: (B, D) f32; weight: (1, D) f32; bias: (1,) f32 -> (B, D) f32."""
    B, D = mol_feature.shape
    if tb is None:
        # Batch tile: full batch for small B, otherwise a multiple of 8 that keeps
        # double-buffered in+out f32 blocks far under the v7x/v5e scoped-VMEM limits.
        tb = B if B <= 512 else 512
    grid = (pl.cdiv(B, tb),)
    bias2d = bias.reshape(1, 1).astype(mol_feature.dtype)

    return pl.pallas_call(
        get_angle_kernel,
        out_shape=jax.ShapeDtypeStruct((B, D), mol_feature.dtype),
        grid_spec=pltpu.PrefetchScalarGridSpec(
            num_scalar_prefetch=0,
            grid=grid,
            in_specs=[
                pl.BlockSpec((tb, D), lambda i: (i, 0)),            # x: batch-tiled
                pl.BlockSpec((1, D), lambda i: (0, 0)),             # weight: resident
                pl.BlockSpec(memory_space=pltpu.MemorySpace.SMEM),  # bias: SMEM scalar
            ],
            out_specs=pl.BlockSpec((tb, D), lambda i: (i, 0)),
        ),
        compiler_params=pltpu.CompilerParams(
            dimension_semantics=("parallel",),
        ),
    )(mol_feature, weight, bias2d)


def get_angle_ref(mol_feature, weight, bias):
    # Pure-JAX reference mirroring the PyTorch forward literally.
    lin = mol_feature @ weight.T + bias                   # (B, 1)
    ones = jnp.ones_like(mol_feature)
    return jnp.abs(ones * lin / jnp.sqrt(ones * ones * lin * lin))


if __name__ == "__main__":
    fingerprint_dim = 32
    batch = 8

    key = jax.random.PRNGKey(0)
    kx, kw, kb = jax.random.split(key, 3)

    mol_feature = jax.random.normal(kx, (batch, fingerprint_dim), dtype=jnp.float32)
    # Deterministic Linear(fingerprint_dim, 1) parameters (synthetic init).
    bound = 1.0 / (fingerprint_dim ** 0.5)
    weight = jax.random.uniform(kw, (1, fingerprint_dim), jnp.float32, -bound, bound)
    bias = jax.random.uniform(kb, (1,), jnp.float32, -bound, bound)

    out = get_angle(mol_feature, weight, bias)
    out = jax.block_until_ready(out)

    ref = get_angle_ref(mol_feature, weight, bias)
    assert out.shape == mol_feature.shape
    assert jnp.allclose(out, ref, atol=1e-5, rtol=1e-5)

    # TODO(synk): with D=32 the output last dim uses 25% of vreg lanes; a lane-dense
    # packed (B//4, 128) layout would help only if the caller can consume that layout.

    print("KERNEL_OK")
</pallas_src>

<mosaic_0001>
module attributes {stable_mosaic.version = 11 : i64} {
  func.func @get_angle_kernel(%arg0: i32, %arg1: memref<8x32xf32, #tpu.memory_space<vmem>>, %arg2: memref<1x32xf32, #tpu.memory_space<vmem>>, %arg3: memref<1x1xf32, #tpu.memory_space<smem>>, %arg4: memref<8x32xf32, #tpu.memory_space<vmem>>) attributes {dimension_semantics = [#tpu.dimension_semantics<parallel>], iteration_bounds = array<i64: 1>, scalar_prefetch = 0 : i64, scratch_operands = 0 : i64, tpu.core_type = #tpu.core_type<tc>, window_params = [{transform_indices = @transform_0, window_bounds = array<i64: 8, 32>}, {pipeline_mode = #tpu.pipeline_mode<synchronous>, transform_indices = @transform_1, window_bounds = array<i64: 1, 32>}, {transform_indices = @transform_2, window_bounds = array<i64: 1, 1>}, {transform_indices = @transform_3, window_bounds = array<i64: 8, 32>}]} {
    %c0 = arith.constant 0 : index
    %c0_0 = arith.constant 0 : index
    %0 = vector.load %arg1[%c0, %c0_0] : memref<8x32xf32, #tpu.memory_space<vmem>>, vector<8x32xf32>
    %c0_1 = arith.constant 0 : index
    %c0_2 = arith.constant 0 : index
    %1 = vector.load %arg2[%c0_1, %c0_2] : memref<1x32xf32, #tpu.memory_space<vmem>>, vector<1x32xf32>
    %c0_3 = arith.constant 0 : index
    %c0_4 = arith.constant 0 : index
    %2 = memref.load %arg3[%c0_3, %c0_4] : memref<1x1xf32, #tpu.memory_space<smem>>
    %3 = vector.broadcast %1 : vector<1x32xf32> to vector<8x32xf32>
    %4 = arith.mulf %0, %3 : vector<8x32xf32>
    %cst = arith.constant dense<0.000000e+00> : vector<8xf32>
    %5 = vector.multi_reduction <add>, %4, %cst [1] : vector<8x32xf32> to vector<8xf32>
    %6 = vector.shape_cast %5 : vector<8xf32> to vector<8x1xf32>
    %7 = vector.broadcast %2 : f32 to vector<8x1xf32>
    %8 = arith.addf %6, %7 : vector<8x1xf32>
    %9 = arith.mulf %8, %8 : vector<8x1xf32>
    %10 = math.rsqrt %9 : vector<8x1xf32>
    %11 = arith.mulf %8, %10 : vector<8x1xf32>
    %12 = math.absf %11 : vector<8x1xf32>
    %13 = vector.shape_cast %12 : vector<8x1xf32> to vector<8x1xf32>
    %14 = vector.broadcast %13 : vector<8x1xf32> to vector<8x32xf32>
    %c0_5 = arith.constant 0 : index
    %c0_6 = arith.constant 0 : index
    %15 = vector.load %arg4[%c0_5, %c0_6] : memref<8x32xf32, #tpu.memory_space<vmem>>, vector<8x32xf32>
    tpu.vector_store %arg4[%c0_5, %c0_6], %14 {strides = array<i32>} : memref<8x32xf32, #tpu.memory_space<vmem>>, vector<8x32xf32>,
    return
  }
  func.func @transform_0(%arg0: i32) -> (i32, i32) {
    %c0_i32 = arith.constant 0 : i32
    %c0_i32_0 = arith.constant 0 : i32
    return %arg0, %c0_i32 : i32, i32
  }
  func.func @transform_1(%arg0: i32) -> (i32, i32) {
    %c0_i32 = arith.constant 0 : i32
    %c0_i32_0 = arith.constant 0 : i32
    %c0_i32_1 = arith.constant 0 : i32
    return %c0_i32, %c0_i32_0 : i32, i32
  }
  func.func @transform_2(%arg0: i32) -> (i32, i32) {
    %c0_i32 = arith.constant 0 : i32
    %c0_i32_0 = arith.constant 0 : i32
    %c0_i32_1 = arith.constant 0 : i32
    return %c0_i32, %c0_i32_0 : i32, i32
  }
  func.func @transform_3(%arg0: i32) -> (i32, i32) {
    %c0_i32 = arith.constant 0 : i32
    %c0_i32_0 = arith.constant 0 : i32
    return %arg0, %c0_i32 : i32, i32
  }
}

</mosaic_0001>

<bundles_post_ra>
// kernel: tpu_custom_call.1
= control target key start
LH: loop header
LB: loop body
LE: loop exit
PB: predicated region body
PF: predicated region fallthrough
CT: control target
= control target key end

     0   :  { %9 = vsyncpa [#allocation4], 0  ;;  %s147_s0 = inlined_call_operand.hbm [shape: f32[8,32], index: 0, kind: input, shape index: {}]   ;;  %s148_s1 = inlined_call_operand.vmem [shape: f32[1,32], index: 1, kind: input, shape index: {}]   ;;  %s149_s2 = inlined_call_operand.<no memory space> [shape: f32[1,1], index: 2, kind: input, shape index: {}]   ;;  %s150_s3 = inlined_call_operand.hbm [shape: f32[8,32], index: 3, kind: output, shape index: {}]  }
   0x1   :  { %10 = vsyncpa [#allocation5], 0  ;;  %s113_s12 = smov [#allocation3]  }
   0x2   :  { %s17_s13 = sshll.u32 %s113_s12, 4  ;;  %s18_s13 = int_to_ptr.vmem [resolvable:$true] %s17_s13 }
   0x3   :  { %s77_s14 = scalar_lea.vmem %s18_s13, 128  ;;  %p82_p1 = scmp.lt.s32.totalorder %s18_s13, %s18_s13 }
   0x4   :  { %p78_p0 = scmp.ne.s32.totalorder %s18_s13, %s77_s14  ;;  %p83_p2 = scmp.lt.s32.totalorder %s77_s14, %s77_s14 }
   0x6   :  { %p84_p3 = por %p83_p2, %p82_p1 }
   0x8   :  { %p85_p4 = pnand %p84_p3, %p78_p0 }
   0xa   :  { %88 = shalt.err (!%p85_p4)
}
   0xb   :  { %20 = dma.hbm_to_vmem [thread:$0]  %s147_s0, 128, %s18_s13, [#allocation4]  }
   0xc   :  { %109 = dma.done.wait [#allocation4], 128  }
   0xd   :  { %110 = vsyncadd [#allocation4], 4294967168  ;;  %v28_v0 = vld [vmem:[#allocation3] sm:$0xff]  ;;  %vm38_vm0 = vcmask 261120   ;;  %v42_v4 = vstv %s149_s2  ;;  %s114_s0 = smov [#allocation6]  }
   0xe   :  { %v64_v1 = vld [vmem:[%s148_s1] ss:$0 sm:$0xff]  ;;  %s55_s21 = sshll.u32 %s114_s0, 4  ;;  %s56_s21 = int_to_ptr.vmem [resolvable:$true] %s55_s21 }
   0xf   :  { %v37_v2 = vmul.f32 %v64_v1, %v28_v0  ;;  %s89_s1 = scalar_lea.vmem %s56_s21, 128  ;;  %p94_p6 = scmp.lt.s32.totalorder %s56_s21, %s56_s21 }
  0x10   :  { %p90_p5 = scmp.ne.s32.totalorder %s56_s21, %s89_s1  ;;  %p95_p7 = scmp.lt.s32.totalorder %s89_s1, %s89_s1 }
  0x11   :  { %v39_v3 = vsel %vm38_vm0, %v37_v2, 0.0 }
  0x12   :  { %40 = vadd.xlane.f32.xlu0 %v39_v3  ;;  %p96_p8 = por %p95_p7, %p94_p6 }
  0x14   :  { %p97_p9 = pnand %p96_p8, %p90_p5 }
  0x9b   :  { %v41_v5 = vpop.xlane.xlu0 %40 }
  0x9c   :  { %v43_v6 = vadd.f32 %v42_v4, %v41_v5 }
  0x9e   :  { %v44_v7 = vmul.f32 %v43_v6, %v43_v6 }
  0xa0   :  { %67 = vrsqrt.f32 %v44_v7 }
  0xad   :  { %v68_v8 = vpop.eup %67 }
  0xae   :  { %v46_v9 = vmul.f32 %v68_v8, %v43_v6 }
  0xb0   :  { %v47_v10 = vand.u32 2147483647, %v46_v9 }
  0xb2   :  { %48 = vst.msk [vmem:[#allocation6] sm:$0xff] %vm38_vm0, %v47_v10 }
  0xb3   :  { %100 = shalt.err (!%p97_p9)
}
  0xb4   :  { %58 = dma.vmem_to_hbm [thread:$0]  %s56_s21, 128, %s150_s3, [#allocation5]  }
  0xb5   :  { %111 = dma.done.wait [#allocation5], 128  }
  0xb6   :  { %112 = vsyncadd [#allocation5], 4294967168 }
  0xb7   :  { %62 = vsyncpa [#allocation4], 1 }
  0xb8   :  { %63 = vsyncpa [#allocation5], 1 }

</bundles_post_ra>
